<compile_context>
chip_gen: v5e
topology: v5e:2x2
jax: 0.10.0
libtpu: 0.0.40
codegen_flags: <defaults>
</compile_context>

<pallas_src>
import functools

import jax
import jax.numpy as jnp
from jax.experimental import pallas as pl
from jax.experimental.pallas import tpu as pltpu


def _round_up(x, m):
    return ((x + m - 1) // m) * m


def _discriminator_kernel(obs_ref, w1_ref, p_ref, b2_ref, out_ref, *,
                          true_h, padded, use_bf16):
    a = obs_ref[...]
    if use_bf16:
        a = a.astype(jnp.bfloat16)          # in-kernel cast: obs stays f32 in HBM

    # fc: (TB, F) @ (F, Hp) on the MXU, f32 accumulation.
    h = jnp.dot(a, w1_ref[...], preferred_element_type=jnp.float32)

    p = p_ref[...]                           # (5, Hp) packed row params, f32
    b1, gamma, beta, w2 = p[0:1], p[1:2], p[2:3], p[3:4]
    h = h + b1

    inv_h = 1.0 / true_h
    # Padded columns of h are exactly 0 (w1/b1 zero-padded), so the plain sum
    # over Hp already equals the sum over the true H columns.
    mean = jnp.sum(h, axis=-1, keepdims=True) * inv_h
    centered = h - mean
    if padded:
        centered = centered * p[4:5]         # zero pad lanes before the var sum
    var = jnp.sum(centered * centered, axis=-1, keepdims=True) * inv_h
    hn = centered * jax.lax.rsqrt(var + 1e-5) * gamma + beta

    # ReLU + head: VPU multiply + lane reduce (gamma/beta/w2 pad lanes are 0).
    hr = jnp.maximum(hn, 0.0)
    logits = jnp.sum(hr * w2, axis=-1, keepdims=True) + b2_ref[0]   # (TB, 1)

    # Lane-dense store: transpose the (TB, 1) column to a (1, TB) row.
    out_ref[0] = jnp.transpose(jnp.tanh(logits))


def discriminator_forward(obs, params, *, tb=512, use_bf16=True,
                          vmem_limit_bytes=None):
    """obs: (B, feature_dim) float32.  params: dict of fc / ln / head weights."""
    B, F = obs.shape
    H = params["w1"].shape[1]
    Hp = _round_up(H, 128)            # lane-align only the hidden dim
    padded = Hp != H
    mm_dtype = jnp.bfloat16 if use_bf16 else jnp.float32

    # w1: cast to the matmul dtype and zero-pad the hidden (lane) dim once.
    w1 = params["w1"].astype(mm_dtype)
    if padded:
        w1 = jnp.pad(w1, ((0, 0), (0, Hp - H)))

    # Pack all per-hidden row parameters into one resident (5, Hp) f32 tile:
    # [b1, ln_gamma, ln_beta, head w2, valid-lane mask].
    def _row(v):
        return jnp.asarray(v, jnp.float32).reshape(1, H)
    packed = jnp.concatenate(
        [_row(params["b1"]), _row(params["ln_g"]), _row(params["ln_b"]),
         _row(params["w2"].reshape(H)), jnp.ones((1, H), jnp.float32)], axis=0)
    if padded:
        packed = jnp.pad(packed, ((0, 0), (0, Hp - H)))
    b2 = jnp.asarray(params["b2"], jnp.float32).reshape(1)   # scalar -> SMEM

    # ---- Batch tiling (obs is read as-is: no wrapper-side copy/pad). ----
    tb = max(8, _round_up(tb, 8))
    if B > tb:
        TB = tb                       # multiple of 8; last block may be partial
    elif B >= 16 and B % 16 == 0:
        TB = B // 2                   # 2 tiles -> both TensorCores on v7x
    else:
        TB = B                        # single full-batch tile (full-dim block)

    def _vmem_estimate(tb_rows):
        mm_bytes = 2 if use_bf16 else 4
        return (2 * tb_rows * F * obs.dtype.itemsize   # double-buffered obs tile
                + 2 * F * Hp * mm_bytes                # resident w1 (2 bufs worst case)
                + 2 * 5 * Hp * 4                       # packed row params
                + 2 * tb_rows * 4                      # lane-dense out tile
                + 6 * tb_rows * Hp * 4)                # h/centered/hn/hr temporaries

    _VMEM_BUDGET = 48 * 1024 * 1024   # conservative: v7x has 64 MiB physical/TC
    if TB % 8 == 0:
        while TB > 8 and _vmem_estimate(TB) > _VMEM_BUDGET:
            TB = max(8, ((TB // 2) + 7) // 8 * 8)

    grid0 = pl.cdiv(B, TB)

    if vmem_limit_bytes is None:
        vmem_limit_bytes = int(min(64 * 1024 * 1024,
                                   max(32 * 1024 * 1024,
                                       1.25 * _vmem_estimate(TB))))

    kernel = functools.partial(_discriminator_kernel, true_h=H, padded=padded,
                               use_bf16=use_bf16)

    out = pl.pallas_call(
        kernel,
        out_shape=jax.ShapeDtypeStruct((grid0, 1, TB), jnp.float32),
        grid=(grid0,),
        in_specs=[
            pl.BlockSpec((TB, F), lambda i: (i, 0)),       # obs tile (pipelined)
            pl.BlockSpec((F, Hp), lambda i: (0, 0)),       # w1, VMEM-resident
            pl.BlockSpec((5, Hp), lambda i: (0, 0)),       # packed row params
            pl.BlockSpec(memory_space=pltpu.MemorySpace.SMEM),  # head bias
        ],
        out_specs=pl.BlockSpec((1, 1, TB), lambda i: (i, 0, 0)),
        compiler_params=pltpu.CompilerParams(
            dimension_semantics=("parallel",),
            vmem_limit_bytes=vmem_limit_bytes),
    )(obs, w1, packed, b2)

    # (grid0, 1, TB) lane-dense rows -> (B, 1); garbage tail rows sliced off.
    return out.reshape(grid0 * TB)[:B].reshape(B, 1)


def init_params(key, feature_dim, hidden_dim):
    k1, k2, k3, k4 = jax.random.split(key, 4)
    # Deterministic synthetic init (stand-in for utils.weight_init).
    w1 = jax.random.normal(k1, (feature_dim, hidden_dim), jnp.float32) * 0.1
    b1 = jnp.zeros((hidden_dim,), jnp.float32)
    ln_g = jnp.ones((hidden_dim,), jnp.float32)
    ln_b = jnp.zeros((hidden_dim,), jnp.float32)
    w2 = jax.random.normal(k3, (hidden_dim, 1), jnp.float32) * 0.1
    b2 = jnp.zeros((1,), jnp.float32)
    return {"w1": w1, "b1": b1, "ln_g": ln_g, "ln_b": ln_b,
            "w2": w2, "b2": b2}


def _reference(obs, p):
    h = obs @ p["w1"] + p["b1"]
    mean = h.mean(-1, keepdims=True)
    var = ((h - mean) ** 2).mean(-1, keepdims=True)
    hn = (h - mean) / jnp.sqrt(var + 1e-5) * p["ln_g"] + p["ln_b"]
    hr = jnp.maximum(hn, 0.0)
    return jnp.tanh(hr @ p["w2"] + p["b2"])


if __name__ == "__main__":
    key = jax.random.PRNGKey(0)
    B, feature_dim, hidden_dim = 8, 16, 32

    k_obs, k_param = jax.random.split(key)
    obs = jax.random.normal(k_obs, (B, feature_dim), jnp.float32)
    params = init_params(k_param, feature_dim, hidden_dim)
    ref = _reference(obs, params)

    # 1) f32 matmul path: tight check against the reference.
    out_f32 = discriminator_forward(obs, params, use_bf16=False)
    jax.block_until_ready(out_f32)
    assert out_f32.shape == (B, 1)
    assert jnp.allclose(out_f32, ref, atol=2e-5, rtol=2e-5)

    # 2) bf16 fc-matmul path (default, in-kernel cast): looser tolerance.
    out_bf16 = discriminator_forward(obs, params, use_bf16=True)
    jax.block_until_ready(out_bf16)
    assert out_bf16.shape == (B, 1)
    assert jnp.allclose(out_bf16, ref, atol=3e-2, rtol=0)

    # 3) Multi-tile grid: B=48, tb=16 -> TB=16, grid=(3,).
    obs3 = jax.random.normal(jax.random.PRNGKey(1), (48, feature_dim),
                             jnp.float32)
    out3 = discriminator_forward(obs3, params, tb=16, use_bf16=False)
    jax.block_until_ready(out3)
    assert out3.shape == (48, 1)
    assert jnp.allclose(out3, _reference(obs3, params), atol=2e-5, rtol=2e-5)

    # 4) Ragged batch, partial edge block, no wrapper pad: B=10, tb=8 -> grid=(2,).
    obs4 = jax.random.normal(jax.random.PRNGKey(2), (10, feature_dim),
                             jnp.float32)
    out4 = discriminator_forward(obs4, params, tb=8, use_bf16=False)
    jax.block_until_ready(out4)
    assert out4.shape == (10, 1)
    assert jnp.allclose(out4, _reference(obs4, params), atol=2e-5, rtol=2e-5)

    # 5) Small even batch splits into 2 tiles (both TCs on v7x): B=32 -> TB=16.
    obs5 = jax.random.normal(jax.random.PRNGKey(3), (32, feature_dim),
                             jnp.float32)
    out5 = discriminator_forward(obs5, params, use_bf16=False)
    jax.block_until_ready(out5)
    assert out5.shape == (32, 1)
    assert jnp.allclose(out5, _reference(obs5, params), atol=2e-5, rtol=2e-5)

    # 6) Hidden dim already lane-aligned (no padding / mask path).
    params128 = init_params(jax.random.PRNGKey(4), feature_dim, 128)
    out6 = discriminator_forward(obs, params128, use_bf16=False)
    jax.block_until_ready(out6)
    assert out6.shape == (B, 1)
    assert jnp.allclose(out6, _reference(obs, params128), atol=2e-5, rtol=2e-5)

    print("KERNEL_OK")
</pallas_src>

<mosaic_0001>
module attributes {stable_mosaic.version = 11 : i64} {
  func.func @_discriminator_kernel(%arg0: i32, %arg1: memref<8x16xf32, #tpu.memory_space<vmem>>, %arg2: memref<16x128xf32, #tpu.memory_space<vmem>>, %arg3: memref<5x128xf32, #tpu.memory_space<vmem>>, %arg4: memref<1xf32, #tpu.memory_space<smem>>, %arg5: memref<1x1x8xf32, #tpu.memory_space<vmem>>) attributes {dimension_semantics = [#tpu.dimension_semantics<parallel>], iteration_bounds = array<i64: 1>, scalar_prefetch = 0 : i64, scratch_operands = 0 : i64, tpu.core_type = #tpu.core_type<tc>, window_params = [{transform_indices = @transform_0, window_bounds = array<i64: 8, 16>}, {pipeline_mode = #tpu.pipeline_mode<synchronous>, transform_indices = @transform_1, window_bounds = array<i64: 16, 128>}, {pipeline_mode = #tpu.pipeline_mode<synchronous>, transform_indices = @transform_2, window_bounds = array<i64: 5, 128>}, {transform_indices = @transform_3, window_bounds = array<i64: 1>}, {transform_indices = @transform_4, window_bounds = array<i64: 1, 1, 8>}]} {
    %c0 = arith.constant 0 : index
    %c0_0 = arith.constant 0 : index
    %0 = vector.load %arg1[%c0, %c0_0] : memref<8x16xf32, #tpu.memory_space<vmem>>, vector<8x16xf32>
    %c0_1 = arith.constant 0 : index
    %c0_2 = arith.constant 0 : index
    %1 = vector.load %arg2[%c0_1, %c0_2] : memref<16x128xf32, #tpu.memory_space<vmem>>, vector<16x128xf32>
    %cst = arith.constant dense<0.000000e+00> : vector<8x128xf32>
    %2 = tpu.matmul %0, %1, %cst {dimension_numbers = #tpu.dot_dimension_numbers<[1], [0], [0], [1], [0, 0, 1, 1], [], []>} : vector<8x16xf32>, vector<16x128xf32>, vector<8x128xf32> -> vector<8x128xf32>
    %c0_3 = arith.constant 0 : index
    %c0_4 = arith.constant 0 : index
    %3 = vector.load %arg3[%c0_3, %c0_4] : memref<5x128xf32, #tpu.memory_space<vmem>>, vector<5x128xf32>
    %4 = vector.extract_strided_slice %3 {offsets = [0, 0], sizes = [1, 128], strides = [1, 1]} : vector<5x128xf32> to vector<1x128xf32>
    %5 = vector.extract_strided_slice %3 {offsets = [1, 0], sizes = [1, 128], strides = [1, 1]} : vector<5x128xf32> to vector<1x128xf32>
    %6 = vector.extract_strided_slice %3 {offsets = [2, 0], sizes = [1, 128], strides = [1, 1]} : vector<5x128xf32> to vector<1x128xf32>
    %7 = vector.extract_strided_slice %3 {offsets = [3, 0], sizes = [1, 128], strides = [1, 1]} : vector<5x128xf32> to vector<1x128xf32>
    %8 = vector.broadcast %4 : vector<1x128xf32> to vector<8x128xf32>
    %9 = arith.addf %2, %8 : vector<8x128xf32>
    %cst_5 = arith.constant dense<0.000000e+00> : vector<8xf32>
    %10 = vector.multi_reduction <add>, %9, %cst_5 [1] : vector<8x128xf32> to vector<8xf32>
    %11 = vector.shape_cast %10 : vector<8xf32> to vector<8x1xf32>
    %cst_6 = arith.constant 3.125000e-02 : f32
    %12 = vector.broadcast %cst_6 : f32 to vector<8x1xf32>
    %13 = arith.mulf %11, %12 : vector<8x1xf32>
    %14 = vector.broadcast %13 : vector<8x1xf32> to vector<8x128xf32>
    %15 = arith.subf %9, %14 : vector<8x128xf32>
    %16 = vector.extract_strided_slice %3 {offsets = [4, 0], sizes = [1, 128], strides = [1, 1]} : vector<5x128xf32> to vector<1x128xf32>
    %17 = vector.broadcast %16 : vector<1x128xf32> to vector<8x128xf32>
    %18 = arith.mulf %15, %17 : vector<8x128xf32>
    %19 = arith.mulf %18, %18 : vector<8x128xf32>
    %cst_7 = arith.constant dense<0.000000e+00> : vector<8xf32>
    %20 = vector.multi_reduction <add>, %19, %cst_7 [1] : vector<8x128xf32> to vector<8xf32>
    %21 = vector.shape_cast %20 : vector<8xf32> to vector<8x1xf32>
    %cst_8 = arith.constant 3.125000e-02 : f32
    %22 = vector.broadcast %cst_8 : f32 to vector<8x1xf32>
    %23 = arith.mulf %21, %22 : vector<8x1xf32>
    %cst_9 = arith.constant 9.99999974E-6 : f32
    %24 = vector.broadcast %cst_9 : f32 to vector<8x1xf32>
    %25 = arith.addf %23, %24 : vector<8x1xf32>
    %26 = math.rsqrt %25 : vector<8x1xf32>
    %27 = vector.broadcast %26 : vector<8x1xf32> to vector<8x128xf32>
    %28 = arith.mulf %18, %27 : vector<8x128xf32>
    %29 = vector.broadcast %5 : vector<1x128xf32> to vector<8x128xf32>
    %30 = arith.mulf %28, %29 : vector<8x128xf32>
    %31 = vector.broadcast %6 : vector<1x128xf32> to vector<8x128xf32>
    %32 = arith.addf %30, %31 : vector<8x128xf32>
    %cst_10 = arith.constant 0.000000e+00 : f32
    %33 = vector.broadcast %cst_10 : f32 to vector<8x128xf32>
    %34 = arith.maximumf %32, %33 : vector<8x128xf32>
    %35 = vector.broadcast %7 : vector<1x128xf32> to vector<8x128xf32>
    %36 = arith.mulf %34, %35 : vector<8x128xf32>
    %cst_11 = arith.constant dense<0.000000e+00> : vector<8xf32>
    %37 = vector.multi_reduction <add>, %36, %cst_11 [1] : vector<8x128xf32> to vector<8xf32>
    %38 = vector.shape_cast %37 : vector<8xf32> to vector<8x1xf32>
    %c0_12 = arith.constant 0 : index
    %39 = memref.load %arg4[%c0_12] : memref<1xf32, #tpu.memory_space<smem>>
    %40 = vector.broadcast %39 : f32 to vector<8x1xf32>
    %41 = arith.addf %38, %40 : vector<8x1xf32>
    %42 = math.tanh %41 : vector<8x1xf32>
    %43 = tpu.transpose %42, [1, 0] : vector<8x1xf32> -> vector<1x8xf32>
    %c0_13 = arith.constant 0 : index
    %c0_14 = arith.constant 0 : index
    %c0_15 = arith.constant 0 : index
    %44 = vector.load %arg5[%c0_13, %c0_14, %c0_15] : memref<1x1x8xf32, #tpu.memory_space<vmem>>, vector<1x1x8xf32>
    %45 = vector.shape_cast %44 : vector<1x1x8xf32> to vector<1x8xf32>
    %46 = vector.shape_cast %43 : vector<1x8xf32> to vector<1x1x8xf32>
    tpu.vector_store %arg5[%c0_13, %c0_14, %c0_15], %46 {strides = array<i32>} : memref<1x1x8xf32, #tpu.memory_space<vmem>>, vector<1x1x8xf32>,
    return
  }
  func.func @transform_0(%arg0: i32) -> (i32, i32) {
    %c0_i32 = arith.constant 0 : i32
    %c0_i32_0 = arith.constant 0 : i32
    return %arg0, %c0_i32 : i32, i32
  }
  func.func @transform_1(%arg0: i32) -> (i32, i32) {
    %c0_i32 = arith.constant 0 : i32
    %c0_i32_0 = arith.constant 0 : i32
    %c0_i32_1 = arith.constant 0 : i32
    return %c0_i32, %c0_i32_0 : i32, i32
  }
  func.func @transform_2(%arg0: i32) -> (i32, i32) {
    %c0_i32 = arith.constant 0 : i32
    %c0_i32_0 = arith.constant 0 : i32
    %c0_i32_1 = arith.constant 0 : i32
    return %c0_i32, %c0_i32_0 : i32, i32
  }
  func.func @transform_3(%arg0: i32) -> i32 {
    %c0_i32 = arith.constant 0 : i32
    %c0_i32_0 = arith.constant 0 : i32
    return %c0_i32 : i32
  }
  func.func @transform_4(%arg0: i32) -> (i32, i32, i32) {
    %c0_i32 = arith.constant 0 : i32
    %c0_i32_0 = arith.constant 0 : i32
    %c0_i32_1 = arith.constant 0 : i32
    return %arg0, %c0_i32, %c0_i32_0 : i32, i32, i32
  }
}

</mosaic_0001>

<bundles_post_ra>
// kernel: tpu_custom_call.1
= control target key start
LH: loop header
LB: loop body
LE: loop exit
PB: predicated region body
PF: predicated region fallthrough
CT: control target
= control target key end

     0   :  { %10 = vsyncpa [#allocation4], 0  ;;  %s338_s0 = inlined_call_operand.hbm [shape: f32[8,16], index: 0, kind: input, shape index: {}]   ;;  %s339_s1 = inlined_call_operand.hbm [shape: f32[16,128], index: 1, kind: input, shape index: {}]   ;;  %s340_s2 = inlined_call_operand.hbm [shape: f32[5,128], index: 2, kind: input, shape index: {}]   ;;  %s341_s3 = inlined_call_operand.<no memory space> [shape: f32[1], index: 3, kind: input, shape index: {}]   ;;  %s342_s4 = inlined_call_operand.hbm [shape: f32[1,1,8], index: 4, kind: output, shape index: {}]  }
   0x1   :  { %11 = vsyncpa [#allocation7], 0  ;;  %s28_s17 = sshll.u32 %s339_s1, 4  ;;  %s29_s17 = int_to_ptr.hbm [resolvable:$true] %s28_s17 }
   0x2   :  { %12 = vsyncpa [#allocation5], 0  ;;  %s292_s18 = smov [#allocation6]   ;;  %s18_s22 = sshll.u32 %s338_s0, 4  ;;  %s19_s22 = int_to_ptr.hbm [resolvable:$true] %s18_s22 }
   0x3   :  { %s30_s19 = sshll.u32 %s292_s18, 4  ;;  %s293_s23 = smov 128   ;;  %s31_s19 = int_to_ptr.vmem [resolvable:$true] %s30_s19 }
   0x4   :  { %s294_s24 = smov 8   ;;  %s295_s25 = smov [#allocation3]  }
   0x5   :  { %36 = dma.hbm_to_vmem [thread:$0]  %s29_s17, 256, %s31_s19, [#allocation7], %s293_s23, %s293_s23, %s294_s24  }
   0x6   :  { %s20_s26 = sshll.u32 %s295_s25, 4  ;;  %s42_s29 = sshll.u32 %s340_s2, 4  ;;  %s21_s26 = int_to_ptr.vmem [resolvable:$true] %s20_s26  ;;  %s43_s29 = int_to_ptr.hbm [resolvable:$true] %s42_s29 }
   0x7   :  { %23 = dma.hbm_to_vmem [thread:$0]  %s19_s22, 128, %s21_s26, [#allocation4]  }
   0x8   :  { %s296_s1 = smov [#allocation8]  }
   0x9   :  { %s44_s30 = sshll.u32 %s296_s1, 4  ;;  %s45_s30 = int_to_ptr.vmem [resolvable:$true] %s44_s30 }
   0xa   :  { %47 = dma.hbm_to_vmem [thread:$0]  %s43_s29, 128, %s45_s30, [#allocation7]  }
   0xb   :  { %286 = dma.done.wait [#allocation4], 128  }
   0xc   :  { %287 = vsyncadd [#allocation4], 4294967168 }
   0xd   :  { %288 = dma.done.wait [#allocation7], 384  }
   0xe   :  { %289 = vsyncadd [#allocation7], 4294966912  ;;  %v64_v0 = vld [vmem:[#allocation6 + $0x8] sm:$0xff]  ;;  %v63_v1 = vld [vmem:[#allocation6] sm:$0xff]  ;;  %vm67_vm0 = vcmask 130048   ;;  %v123_v31 = vstv %s341_s3  ;;  %s297_s5 = smov [#allocation9]  }
   0xf   :  { %85 = vmatpush.msra.mxu0 %v64_v0  ;;  %v62_v2 = vld [vmem:[#allocation3] sm:$0xff]  ;;  %v65_v3 = vld [vmem:[#allocation8] sm:$0x1f]  ;;  %s165_s6 = sshll.u32 %s297_s5, 4  ;;  %s167_s9 = sshll.u32 %s342_s4, 4  ;;  %vm158_vm4 = vcmask 57344   ;;  %s166_s6 = int_to_ptr.vmem [resolvable:$true] %s165_s6  ;;  %s168_s9 = int_to_ptr.hbm [resolvable:$true] %s167_s9 }
  0x10   :  { %v66_v4 = vperm.slane %v65_v3, 0  ;;  %v95_v9 = vperm.slane %v65_v3, 4  ;;  %v113_v22 = vperm.slane %v65_v3, 1  ;;  %v115_v25 = vperm.slane %v65_v3, 2 }
  0x11   :  { %86 = vmatpush.msra.mxu0 %v63_v1  ;;  %v118_v28 = vperm.slane %v65_v3, 3 }
  0x12   :  { %178 = vmatmul.msk.f32.vlgmr.msra.gmra.mxu0 %vm67_vm0, %v62_v2 }
  0x8f   :  { %v88_v5 = vpop.f32.mrf.mxu0 }
  0x90   :  { %v89_v6 = vadd.f32 %v88_v5, %v66_v4 }
  0x92   :  { %91 = vadd.xlane.f32.xlu0 %v89_v6 }
 0x105   :  { %v92_v7 = vpop.xlane.xlu0 %91 }
 0x106   :  { %v93_v8 = vmul.f32 0.03125, %v92_v7 }
 0x108   :  { %v94_v10 = vsub.f32 %v89_v6, %v93_v8 }
 0x10a   :  { %v96_v11 = vmul.f32 %v95_v9, %v94_v10 }
 0x10c   :  { %v97_v12 = vmul.f32 %v96_v11, %v96_v11 }
 0x10e   :  { %98 = vadd.xlane.f32.xlu0 %v97_v12 }
 0x181   :  { %v99_v13 = vpop.xlane.xlu0 %98 }
 0x182   :  { %v100_v14 = vmul.f32 0.03125, %v99_v13 }
 0x184   :  { %v101_v15 = vadd.f32 1e-05, %v100_v14 }
 0x186   :  { %186 = vrsqrt.f32 %v101_v15  ;;  %vm108_vm2 = vweird.f32 %v101_v15 }
 0x18c   :  { %v187_v16 = vpop.eup %186 }
 0x18d   :  { %v103_v17 = vmul.f32 %v187_v16, %v101_v15  ;;  %vm109_vm1 = vweird.f32 %v187_v16 }
 0x18e   :  { %vm110_vm3 = vmor %vm108_vm2, %vm109_vm1 }
 0x18f   :  { %v104_v18 = vmul.f32 %v187_v16, %v103_v17 }
 0x191   :  { %v105_v19 = vmul.f32 0.5, %v104_v18 }
 0x193   :  { %v106_v20 = vsub.f32 1.5, %v105_v19 }
 0x195   :  { %v107_v21 = vmul.f32 %v187_v16, %v106_v20 }
 0x197   :  { %v111_v23 = vsel %vm110_vm3, %v187_v16, %v107_v21 }
 0x198   :  { %v112_v24 = vmul.f32 %v111_v23, %v96_v11 }
 0x19a   :  { %v114_v26 = vmul.f32 %v113_v22, %v112_v24 }
 0x19c   :  { %v116_v27 = vadd.f32 %v115_v25, %v114_v26 }
 0x19e   :  { %v117_v29 = vmax.f32 %v116_v27, 0.0 }
 0x1a0   :  { %v119_v30 = vmul.f32 %v118_v28, %v117_v29 }
 0x1a2   :  { %120 = vadd.xlane.f32.xlu1 %v119_v30 }
 0x215   :  { %v121_v32 = vpop.xlane.xlu1 %120 }
 0x216   :  { %v124_v33 = vadd.f32 %v123_v31, %v121_v32 }
 0x218   :  { %188 = vtanh.f32 %v124_v33 }
 0x21e   :  { %v189_v34 = vpop.eup %188 }
 0x21f   :  { %126 = vxpose.xlu1.b32.start.end [1/1] (short) (narrow) %v189_v34, 8 }
 0x2c3   :  { %v142_v35 = vpop.trf.xlu1 }
 0x2c4   :  { %159 = vst.msk [vmem:[#allocation9] sm:$0x1] %vm158_vm4, %v142_v35 }
 0x2c5   :  { %170 = dma.vmem_to_hbm [thread:$0]  %s166_s6, 16, %s168_s9, [#allocation5]  }
 0x2c6   :  { %290 = dma.done.wait [#allocation5], 16  }
 0x2c7   :  { %291 = vsyncadd [#allocation5], 4294967280 }
 0x2c8   :  { %175 = vsyncpa [#allocation4], 1 }
 0x2c9   :  { %176 = vsyncpa [#allocation7], 1 }
 0x2ca   :  { %177 = vsyncpa [#allocation5], 1 }

</bundles_post_ra>
